<compile_context>
chip_gen: v5e
topology: v5e:2x2
jax: 0.10.0
libtpu: 0.0.40
codegen_flags: <defaults>
</compile_context>

<pallas_src>
import jax
import jax.numpy as jnp
from jax import lax
from jax.experimental import pallas as pl
from jax.experimental.pallas import tpu as pltpu

SHOT_NUM = 8
SIM_CHANNEL = 128

_VMEM = pl.BlockSpec(memory_space=pltpu.MemorySpace.VMEM)


def _round_up(n, m):
    return (n + m - 1) // m * m


# ------------------------------------------------------------------------------
# Pallas kernel: shared Linear on both shot-halves + cosine similarity
# ------------------------------------------------------------------------------
def _cossim_kernel(p_ref, w_ref, b_ref, out_ref):
    # p_ref:   (2B, half*D) f32   interleaved rows: even = p1[b], odd = p2[b]
    # w_ref:   (half*D, SIM_CHANNEL) bf16
    # b_ref:   (1, SIM_CHANNEL) f32
    # out_ref: (Mo, SIM_CHANNEL) f32, Mo = round_up(B, 8); sim broadcast on lanes
    m_in = p_ref.shape[0]        # 2B
    m_out = out_ref.shape[0]     # round_up(B, 8)

    # One MXU pass over the shared (bf16) weight for BOTH halves, f32 accumulate.
    lhs = p_ref[...].astype(jnp.bfloat16)
    v = jnp.dot(lhs, w_ref[...], preferred_element_type=jnp.float32)
    v = v + b_ref[...]                                            # (2B, 128) f32

    # De-interleave AFTER the matmul, in VMEM, with one-hot selection matmuls:
    # output row i of v1 / v2 picks input row 2i / 2i+1.  Rows i >= B select
    # nothing (all-zero) and are sliced away by the wrapper.
    out_row = lax.broadcasted_iota(jnp.int32, (m_out, m_in), 0)
    in_row = lax.broadcasted_iota(jnp.int32, (m_out, m_in), 1)
    sel1 = (in_row == 2 * out_row).astype(jnp.float32)
    sel2 = (in_row == 2 * out_row + 1).astype(jnp.float32)
    v1 = jnp.dot(sel1, v, preferred_element_type=jnp.float32)     # (Mo, 128)
    v2 = jnp.dot(sel2, v, preferred_element_type=jnp.float32)     # (Mo, 128)

    dot12 = jnp.sum(v1 * v2, axis=1, keepdims=True)               # (Mo, 1)
    s1 = jnp.sum(v1 * v1, axis=1, keepdims=True)
    s2 = jnp.sum(v2 * v2, axis=1, keepdims=True)

    eps = jnp.float32(1e-8)                                       # torch default
    # max(sqrt(s), eps) == sqrt(max(s, eps^2)): per-norm clamping, identical to
    # modern torch.nn.functional.cosine_similarity.  Both rsqrt's go to the EUP.
    inv1 = lax.rsqrt(jnp.maximum(s1, eps * eps))
    inv2 = lax.rsqrt(jnp.maximum(s2, eps * eps))
    sim = dot12 * inv1 * inv2                                     # (Mo, 1)

    # Lane-dense, full-sublane store (no vst.msk); wrapper takes lane 0.
    out_ref[...] = jnp.broadcast_to(sim, out_ref.shape)


def cos_sim_block(x, w_lin, b_lin):
    """CosSimBlock.forward.

    x:     (B, SHOT_NUM, D) f32
    w_lin: (SHOT_NUM//2 * D, SIM_CHANNEL) — nn.Linear weight transposed to
           (in, out); any float dtype (cast to bf16 here — store it in bf16 to
           make the cast a no-op).
    b_lin: (1, SIM_CHANNEL) f32
    Returns (B,) f32 cosine similarities.
    """
    B, S, D = x.shape
    assert S == SHOT_NUM, f"expected S == SHOT_NUM ({SHOT_NUM}), got {S}"
    half = SHOT_NUM // 2
    K = half * D
    assert w_lin.shape == (K, SIM_CHANNEL), w_lin.shape

    # Free contiguous view (no transpose, no pad, no cast of x => no HBM copy):
    # row 2b == p1[b].reshape(-1), row 2b+1 == p2[b].reshape(-1).
    p = x.reshape(2 * B, K)
    w = w_lin.astype(jnp.bfloat16)            # no-op if already stored as bf16
    b = b_lin.reshape(1, SIM_CHANNEL).astype(jnp.float32)

    m_out = _round_up(B, 8)                   # unmasked full-vreg output stores

    cost = pl.CostEstimate(
        flops=2 * (2 * B) * K * SIM_CHANNEL
        + 2 * 2 * m_out * (2 * B) * SIM_CHANNEL,
        transcendentals=2 * m_out,
        bytes_accessed=p.size * 4 + w.size * 2 + b.size * 4
        + m_out * SIM_CHANNEL * 4,
    )

    # Gridless on purpose: ~2 MFLOP, <0.6 MB of VMEM-resident operands — any
    # grid step would cost more in per-step overhead than the whole kernel.
    # Scaling plan if B ever grows large: 1-D grid over batch tiles
    # (>= 256 rows/step), weight BlockSpec index_map returning (0, 0) so the
    # bf16 weight stays VMEM-resident, dimension_semantics=("parallel",) so
    # v7x shards it across both TensorCores, tiles sized against the default
    # scoped-VMEM limits (16 MiB v5e, 32 MiB v6e/v7x).
    sim_padded = pl.pallas_call(
        _cossim_kernel,
        out_shape=jax.ShapeDtypeStruct((m_out, SIM_CHANNEL), jnp.float32),
        in_specs=[_VMEM, _VMEM, _VMEM],
        out_specs=_VMEM,
        cost_estimate=cost,
    )(p, w, b)
    return sim_padded[:B, 0]                  # (B,)


# ------------------------------------------------------------------------------
# Pure-JAX reference (modern-torch cosine_similarity semantics)
# ------------------------------------------------------------------------------
def cos_sim_ref(x, w_lin, b_lin):
    B, S, D = x.shape
    half = SHOT_NUM // 2
    p1 = x[:, :half, :].reshape(B, -1)
    p2 = x[:, half:, :].reshape(B, -1)
    w = w_lin.astype(jnp.float32)
    bb = b_lin.reshape(1, -1).astype(jnp.float32)
    v1 = jnp.dot(p1, w, precision=lax.Precision.HIGHEST) + bb
    v2 = jnp.dot(p2, w, precision=lax.Precision.HIGHEST) + bb
    eps = jnp.float32(1e-8)
    n1 = jnp.maximum(jnp.sqrt(jnp.sum(v1 * v1, axis=1)), eps)
    n2 = jnp.maximum(jnp.sqrt(jnp.sum(v2 * v2, axis=1)), eps)
    return jnp.sum(v1 * v2, axis=1) / (n1 * n2)


if __name__ == "__main__":
    key = jax.random.PRNGKey(0)
    kx, kw, kb = jax.random.split(key, 3)

    # Shapes consistent with the module: dim = ResNet18 fc.in_features = 512.
    B, D = 2, 512
    fan_in = (SHOT_NUM // 2) * D
    bound = 1.0 / (fan_in ** 0.5)

    x = jax.random.normal(kx, (B, SHOT_NUM, D), jnp.float32)
    # nn.Linear(fan_in, SIM_CHANNEL): weight stored transposed (in, out);
    # bias uniform like PyTorch's default init.
    w_lin = jax.random.uniform(kw, (fan_in, SIM_CHANNEL), jnp.float32, -bound, bound)
    b_lin = jax.random.uniform(kb, (1, SIM_CHANNEL), jnp.float32, -bound, bound)

    # Store the Linear weight in bf16 once: its DMA is the kernel's dominant
    # cost on every TPU generation, and bf16 is the native MXU input type.
    w_bf16 = w_lin.astype(jnp.bfloat16)

    sim = jax.jit(cos_sim_block)(x, w_bf16, b_lin)
    jax.block_until_ready(sim)

    ref = cos_sim_ref(x, w_bf16, b_lin)   # same (quantized) weight as the kernel
    assert sim.shape == (B,) and sim.dtype == jnp.float32
    assert bool(jnp.all(jnp.isfinite(sim)))
    assert bool(jnp.allclose(sim, ref, atol=2e-2, rtol=2e-2)), (sim, ref)
    print("KERNEL_OK")
</pallas_src>

<mosaic_0001>
module attributes {stable_mosaic.version = 11 : i64} {
  func.func @_cossim_kernel(%arg0: memref<4x2048xf32, #tpu.memory_space<vmem>>, %arg1: memref<2048x128xbf16, #tpu.memory_space<vmem>>, %arg2: memref<1x128xf32, #tpu.memory_space<vmem>>, %arg3: memref<8x128xf32, #tpu.memory_space<vmem>>) attributes {dimension_semantics = [], scalar_prefetch = 0 : i64, scratch_operands = 0 : i64, tpu.core_type = #tpu.core_type<tc>} {
    %c0 = arith.constant 0 : index
    %c0_0 = arith.constant 0 : index
    %0 = vector.load %arg0[%c0, %c0_0] : memref<4x2048xf32, #tpu.memory_space<vmem>>, vector<4x2048xf32>
    %1 = arith.truncf %0 : vector<4x2048xf32> to vector<4x2048xbf16>
    %c0_1 = arith.constant 0 : index
    %c0_2 = arith.constant 0 : index
    %2 = vector.load %arg1[%c0_1, %c0_2] : memref<2048x128xbf16, #tpu.memory_space<vmem>>, vector<2048x128xbf16>
    %cst = arith.constant dense<0.000000e+00> : vector<4x128xf32>
    %3 = tpu.matmul %1, %2, %cst {dimension_numbers = #tpu.dot_dimension_numbers<[1], [0], [0], [1], [0, 0, 1, 1], [], []>} : vector<4x2048xbf16>, vector<2048x128xbf16>, vector<4x128xf32> -> vector<4x128xf32>
    %c0_3 = arith.constant 0 : index
    %c0_4 = arith.constant 0 : index
    %4 = vector.load %arg2[%c0_3, %c0_4] : memref<1x128xf32, #tpu.memory_space<vmem>>, vector<1x128xf32>
    %5 = vector.broadcast %4 : vector<1x128xf32> to vector<4x128xf32>
    %6 = arith.addf %3, %5 : vector<4x128xf32>
    %7 = tpu.iota {dimensions = array<i32: 0>} : vector<8x4xi32>
    %8 = tpu.iota {dimensions = array<i32: 1>} : vector<8x4xi32>
    %c2_i32 = arith.constant 2 : i32
    %9 = vector.broadcast %c2_i32 : i32 to vector<8x4xi32>
    %10 = arith.muli %9, %7 : vector<8x4xi32>
    %11 = arith.cmpi eq, %8, %10 : vector<8x4xi32>
    %12 = arith.extui %11 : vector<8x4xi1> to vector<8x4xi32>
    %13 = arith.sitofp %12 : vector<8x4xi32> to vector<8x4xf32>
    %c2_i32_5 = arith.constant 2 : i32
    %14 = vector.broadcast %c2_i32_5 : i32 to vector<8x4xi32>
    %15 = arith.muli %14, %7 : vector<8x4xi32>
    %c1_i32 = arith.constant 1 : i32
    %16 = vector.broadcast %c1_i32 : i32 to vector<8x4xi32>
    %17 = arith.addi %15, %16 : vector<8x4xi32>
    %18 = arith.cmpi eq, %8, %17 : vector<8x4xi32>
    %19 = arith.extui %18 : vector<8x4xi1> to vector<8x4xi32>
    %20 = arith.sitofp %19 : vector<8x4xi32> to vector<8x4xf32>
    %cst_6 = arith.constant dense<0.000000e+00> : vector<8x128xf32>
    %21 = tpu.matmul %13, %6, %cst_6 {dimension_numbers = #tpu.dot_dimension_numbers<[1], [0], [0], [1], [0, 0, 1, 1], [], []>} : vector<8x4xf32>, vector<4x128xf32>, vector<8x128xf32> -> vector<8x128xf32>
    %cst_7 = arith.constant dense<0.000000e+00> : vector<8x128xf32>
    %22 = tpu.matmul %20, %6, %cst_7 {dimension_numbers = #tpu.dot_dimension_numbers<[1], [0], [0], [1], [0, 0, 1, 1], [], []>} : vector<8x4xf32>, vector<4x128xf32>, vector<8x128xf32> -> vector<8x128xf32>
    %23 = arith.mulf %21, %22 : vector<8x128xf32>
    %cst_8 = arith.constant dense<0.000000e+00> : vector<8xf32>
    %24 = vector.multi_reduction <add>, %23, %cst_8 [1] : vector<8x128xf32> to vector<8xf32>
    %25 = vector.shape_cast %24 : vector<8xf32> to vector<8x1xf32>
    %26 = arith.mulf %21, %21 : vector<8x128xf32>
    %cst_9 = arith.constant dense<0.000000e+00> : vector<8xf32>
    %27 = vector.multi_reduction <add>, %26, %cst_9 [1] : vector<8x128xf32> to vector<8xf32>
    %28 = vector.shape_cast %27 : vector<8xf32> to vector<8x1xf32>
    %29 = arith.mulf %22, %22 : vector<8x128xf32>
    %cst_10 = arith.constant dense<0.000000e+00> : vector<8xf32>
    %30 = vector.multi_reduction <add>, %29, %cst_10 [1] : vector<8x128xf32> to vector<8xf32>
    %31 = vector.shape_cast %30 : vector<8xf32> to vector<8x1xf32>
    %cst_11 = arith.constant 9.99999993E-9 : f32
    %cst_12 = arith.constant 9.99999993E-9 : f32
    %32 = arith.mulf %cst_11, %cst_12 : f32
    %33 = vector.broadcast %32 : f32 to vector<8x1xf32>
    %34 = arith.maximumf %28, %33 : vector<8x1xf32>
    %35 = math.rsqrt %34 : vector<8x1xf32>
    %cst_13 = arith.constant 9.99999993E-9 : f32
    %cst_14 = arith.constant 9.99999993E-9 : f32
    %36 = arith.mulf %cst_13, %cst_14 : f32
    %37 = vector.broadcast %36 : f32 to vector<8x1xf32>
    %38 = arith.maximumf %31, %37 : vector<8x1xf32>
    %39 = math.rsqrt %38 : vector<8x1xf32>
    %40 = arith.mulf %25, %35 : vector<8x1xf32>
    %41 = arith.mulf %40, %39 : vector<8x1xf32>
    %42 = vector.shape_cast %41 : vector<8x1xf32> to vector<8x1xf32>
    %43 = vector.broadcast %42 : vector<8x1xf32> to vector<8x128xf32>
    %c0_15 = arith.constant 0 : index
    %c0_16 = arith.constant 0 : index
    %44 = vector.load %arg3[%c0_15, %c0_16] : memref<8x128xf32, #tpu.memory_space<vmem>>, vector<8x128xf32>
    tpu.vector_store %arg3[%c0_15, %c0_16], %43 {strides = array<i32>} : memref<8x128xf32, #tpu.memory_space<vmem>>, vector<8x128xf32>,
    return
  }
}

</mosaic_0001>

<bundles_post_ra>
// kernel: cos_sim_block.1
= control target key start
LH: loop header
LB: loop body
LE: loop exit
PB: predicated region body
PF: predicated region fallthrough
CT: control target
= control target key end

     0   :  { %8 = vsyncpa [#allocation3], 0  ;;  %s2124_s15 = smov [#allocation2]   ;;  %s2125_s17 = smov 64   ;;  %s2193_s0 = inlined_call_operand.vmem [shape: f32[4,2048], index: 0, kind: input, shape index: {}]   ;;  %s2194_s1 = inlined_call_operand.hbm [shape: bf16[2048,128], index: 1, kind: input, shape index: {}]   ;;  %s2195_s2 = inlined_call_operand.vmem [shape: f32[1,128], index: 2, kind: input, shape index: {}]   ;;  %s2196_s3 = inlined_call_operand.vmem [shape: f32[8,128], index: 3, kind: output, shape index: {}]  }
   0x1   :  { %s15_s14 = sshll.u32 %s2194_s1, 4  ;;  %s17_s16 = sshll.u32 %s2124_s15, 4  ;;  %s16_s14 = int_to_ptr.hbm [resolvable:$true] %s15_s14  ;;  %s18_s16 = int_to_ptr.vmem [resolvable:$true] %s17_s16 }
   0x2   :  { %s2126_s18 = smov 4  }
   0x3   :  { %23 = dma.hbm_to_vmem [thread:$0]  %s16_s14, 16384, %s18_s16, [#allocation3], %s2125_s17, %s2125_s17, %s2126_s18  }
   0x4   :  { %2122 = dma.done.wait [#allocation3], 16384  }
   0x5   :  { %2123 = vsyncadd [#allocation3], 4294950912  ;;  %v1968_v0 = vld [vmem:[#allocation2 + $0x38] sm:$0xff]  ;;  %v1967_v4 = vld [vmem:[#allocation2 + $0x30] sm:$0xff]  ;;  %vm1357_vm2 = vcmask 1043456   ;;  %vm1353_vm3 = vcmask 31744  }
   0x6   :  { %v1976_v1 = vld [vmem:[#allocation2 + $0x78] sm:$0xff]  ;;  %1133 = vmatpush.bf16.msra.mxu0 %v1968_v0  ;;  %v1975_v5 = vld [vmem:[#allocation2 + $0x70] sm:$0xff]  ;;  %v1966_v8 = vld [vmem:[#allocation2 + $0x28] sm:$0xff] }
   0x7   :  { %v1984_v2 = vld [vmem:[#allocation2 + $0xb8] sm:$0xff]  ;;  %1146 = vmatpush.bf16.msra.mxu1 %v1976_v1  ;;  %v1983_v6 = vld [vmem:[#allocation2 + $0xb0] sm:$0xff]  ;;  %v1974_v9 = vld [vmem:[#allocation2 + $0x68] sm:$0xff] }
   0x8   :  { %v1992_v3 = vld [vmem:[#allocation2 + $0xf8] sm:$0xff]  ;;  %1159 = vmatpush.bf16.msra.mxu2 %v1984_v2  ;;  %v1991_v7 = vld [vmem:[#allocation2 + $0xf0] sm:$0xff]  ;;  %v1982_v10 = vld [vmem:[#allocation2 + $0xa8] sm:$0xff] }
   0x9   :  { %1172 = vmatpush.bf16.msra.mxu3 %v1992_v3  ;;  %v1990_v11 = vld [vmem:[#allocation2 + $0xe8] sm:$0xff]  ;;  %v1965_v12 = vld [vmem:[#allocation2 + $0x20] sm:$0xff]  ;;  %v1964_v16 = vld [vmem:[#allocation2 + $0x18] sm:$0xff] }
   0xa   :  { %1134 = vmatpush.bf16.msra.mxu0 %v1967_v4  ;;  %v1973_v13 = vld [vmem:[#allocation2 + $0x60] sm:$0xff]  ;;  %v1972_v17 = vld [vmem:[#allocation2 + $0x58] sm:$0xff]  ;;  %v1963_v20 = vld [vmem:[#allocation2 + $0x10] sm:$0xff] }
   0xb   :  { %1147 = vmatpush.bf16.msra.mxu1 %v1975_v5  ;;  %v1981_v14 = vld [vmem:[#allocation2 + $0xa0] sm:$0xff]  ;;  %v1980_v18 = vld [vmem:[#allocation2 + $0x98] sm:$0xff]  ;;  %v1971_v22 = vld [vmem:[#allocation2 + $0x50] sm:$0xff] }
   0xc   :  { %1160 = vmatpush.bf16.msra.mxu2 %v1983_v6  ;;  %v1989_v15 = vld [vmem:[#allocation2 + $0xe0] sm:$0xff]  ;;  %v1988_v19 = vld [vmem:[#allocation2 + $0xd8] sm:$0xff]  ;;  %v1979_v24 = vld [vmem:[#allocation2 + $0x90] sm:$0xff] }
   0xd   :  { %1173 = vmatpush.bf16.msra.mxu3 %v1991_v7  ;;  %v31_v21 = vld [vmem:[%s2193_s0 + $0x8] sm:$0xff]  ;;  %v30_v23 = vld [vmem:[%s2193_s0] sm:$0xff]  ;;  %v1987_v25 = vld [vmem:[#allocation2 + $0xd0] sm:$0xff] }
   0xe   :  { %1135 = vmatpush.bf16.msra.mxu0 %v1966_v8  ;;  %48 = vst [vmem:[#allocation1 + $0x10] ss:$2 sm:$0xff] %v31_v21  ;;  %v1962_v26 = vld [vmem:[#allocation2 + $0x8] sm:$0xff]  ;;  %v35_v30 = vld [vmem:[%s2193_s0 + $0x28] sm:$0xff]  ;;  %v34_v37 = vld [vmem:[%s2193_s0 + $0x20] sm:$0xff] }
   0xf   :  { %1148 = vmatpush.bf16.msra.mxu1 %v1974_v9  ;;  %46 = vst [vmem:[#allocation1] ss:$2 sm:$0xff] %v30_v23  ;;  %v1970_v27 = vld [vmem:[#allocation2 + $0x48] sm:$0xff]  ;;  %v1961_v31 = vld [vmem:[#allocation2] sm:$0xff]  ;;  %v2000_v40 = vld [vmem:[#allocation2 + $0x138] sm:$0xff] }
  0x10   :  { %1161 = vmatpush.bf16.msra.mxu2 %v1982_v10  ;;  %v1978_v28 = vld [vmem:[#allocation2 + $0x88] sm:$0xff]  ;;  %v1969_v32 = vld [vmem:[#allocation2 + $0x40] sm:$0xff]  ;;  %v2008_v41 = vld [vmem:[#allocation2 + $0x178] sm:$0xff] }
  0x11   :  { %1174 = vmatpush.bf16.msra.mxu3 %v1990_v11  ;;  %v1986_v29 = vld [vmem:[#allocation2 + $0xc8] sm:$0xff]  ;;  %v1977_v35 = vld [vmem:[#allocation2 + $0x80] sm:$0xff]  ;;  %v2016_v42 = vld [vmem:[#allocation2 + $0x1b8] sm:$0xff] }
  0x12   :  { %1136 = vmatpush.bf16.msra.mxu0 %v1965_v12  ;;  %v1985_v36 = vld [vmem:[#allocation2 + $0xc0] sm:$0xff]  ;;  %v2024_v43 = vld [vmem:[#allocation2 + $0x1f8] sm:$0xff]  ;;  %v33_v46 = vld [vmem:[%s2193_s0 + $0x18] sm:$0xff] }
  0x13   :  { %1149 = vmatpush.bf16.msra.mxu1 %v1973_v13  ;;  %v32_v47 = vld [vmem:[%s2193_s0 + $0x10] sm:$0xff]  ;;  %52 = vst [vmem:[#allocation1 + $0x30] ss:$2 sm:$0xff] %v33_v46  ;;  %v1999_v50 = vld [vmem:[#allocation2 + $0x130] sm:$0xff]  ;;  %v1997_v58 = vld [vmem:[#allocation2 + $0x120] sm:$0xff] }
  0x14   :  { %1162 = vmatpush.bf16.msra.mxu2 %v1981_v14  ;;  %v2007_v51 = vld [vmem:[#allocation2 + $0x170] sm:$0xff]  ;;  %50 = vst [vmem:[#allocation1 + $0x20] ss:$2 sm:$0xff] %v32_v47  ;;  %v1998_v54 = vld [vmem:[#allocation2 + $0x128] sm:$0xff]  ;;  %v2005_v0 = vld [vmem:[#allocation2 + $0x160] sm:$0xff] }
  0x15   :  { %1175 = vmatpush.bf16.msra.mxu3 %v1989_v15  ;;  %v55_v33 = vld.sshfl [vmem:[#allocation1 + $0x10] sm:$0xff pattern:$0x75316420]  ;;  %v56_v34 = vld.sshfl [vmem:[#allocation1 + $0x18] sm:$0xff pattern:$0x75316420] }
  0x16   :  { %1137 = vmatpush.bf16.msra.mxu0 %v1964_v16  ;;  %62 = vst [vmem:[#allocation1 + $0x10] ss:$2 sm:$0xff] %v35_v30  ;;  %v53_v38 = vld.sshfl [vmem:[#allocation1] sm:$0xff pattern:$0x75316420]  ;;  %v91_v44 = vpack.c.bf16 %v55_v33, %v55_v33  ;;  %v92_v48 = vpack.c.bf16 %v56_v34, %v56_v34  ;;  %v2015_v52 = vld [vmem:[#allocation2 + $0x1b0] sm:$0xff] }
  0x17   :  { %1150 = vmatpush.bf16.msra.mxu1 %v1972_v17  ;;  %v54_v39 = vld.sshfl [vmem:[#allocation1 + $0x8] sm:$0xff pattern:$0x75316420]  ;;  %v89_v45 = vpack.c.bf16 %v53_v38, %v53_v38  ;;  %v2023_v53 = vld [vmem:[#allocation2 + $0x1f0] sm:$0xff]  ;;  %v2006_v55 = vld [vmem:[#allocation2 + $0x168] sm:$0xff] }
  0x18   :  { %1163 = vmatpush.bf16.msra.mxu2 %v1980_v18  ;;  %61 = vst [vmem:[#allocation1] ss:$2 sm:$0xff] %v34_v37  ;;  %v90_v49 = vpack.c.bf16 %v54_v39, %v54_v39  ;;  %v2014_v56 = vld [vmem:[#allocation2 + $0x1a8] sm:$0xff]  ;;  %v37_v62 = vld [vmem:[%s2193_s0 + $0x38] sm:$0xff]  ;;  %v2013_v2 = vld [vmem:[#allocation2 + $0x1a0] sm:$0xff] }
  0x19   :  { %1176 = vmatpush.bf16.msra.mxu3 %v1988_v19  ;;  %v2022_v57 = vld [vmem:[#allocation2 + $0x1e8] sm:$0xff]  ;;  %v2021_v3 = vld [vmem:[#allocation2 + $0x1e0] sm:$0xff]  ;;  %v1996_v4 = vld [vmem:[#allocation2 + $0x118] sm:$0xff] }
  0x1a   :  { %1138 = vmatpush.bf16.msra.mxu0 %v1963_v20  ;;  %v2169_v59 = vld.sshfl [vmem:[#allocation1 + $0x30] sm:$0xff pattern:$0x75316420]  ;;  %v2171_v60 = vld.sshfl [vmem:[#allocation1 + $0x38] sm:$0xff pattern:$0x75316420] }
  0x1b   :  { %1151 = vmatpush.bf16.msra.mxu1 %v1971_v22  ;;  %v2173_v61 = vld.sshfl [vmem:[#allocation1 + $0x20] sm:$0xff pattern:$0x75316420]  ;;  %v36_v63 = vld [vmem:[%s2193_s0 + $0x30] sm:$0xff]  ;;  %64 = vst [vmem:[#allocation1 + $0x30] ss:$2 sm:$0xff] %v37_v62 }
  0x1c   :  { %1164 = vmatpush.bf16.msra.mxu2 %v1979_v24  ;;  %v58_v1 = vld.sshfl [vmem:[#allocation1 + $0x28] sm:$0xff pattern:$0x75316420]  ;;  %v2004_v5 = vld [vmem:[#allocation2 + $0x158] sm:$0xff]  ;;  %v1995_v8 = vld [vmem:[#allocation2 + $0x110] sm:$0xff]  ;;  %v95_v24 = vpack.c.bf16 %v2169_v59, %v2169_v59 }
  0x1d   :  { %1177 = vmatpush.bf16.msra.mxu3 %v1987_v25  ;;  %63 = vst [vmem:[#allocation1 + $0x20] ss:$2 sm:$0xff] %v36_v63  ;;  %v2012_v6 = vld [vmem:[#allocation2 + $0x198] sm:$0xff]  ;;  %v2003_v9 = vld [vmem:[#allocation2 + $0x150] sm:$0xff]  ;;  %v1994_v12 = vld [vmem:[#allocation2 + $0x108] sm:$0xff]  ;;  %v93_v25 = vpack.c.bf16 %v2173_v61, %v2173_v61 }
  0x1e   :  { %1139 = vmatpush.bf16.msra.mxu0 %v1962_v26  ;;  %v2020_v7 = vld [vmem:[#allocation2 + $0x1d8] sm:$0xff]  ;;  %v2011_v10 = vld [vmem:[#allocation2 + $0x190] sm:$0xff]  ;;  %v2002_v13 = vld [vmem:[#allocation2 + $0x148] sm:$0xff]  ;;  %v96_v26 = vpack.c.bf16 %v2171_v60, %v2171_v60 }
  0x1f   :  { %1152 = vmatpush.bf16.msra.mxu1 %v1970_v27  ;;  %v2019_v11 = vld [vmem:[#allocation2 + $0x1d0] sm:$0xff]  ;;  %v2010_v14 = vld [vmem:[#allocation2 + $0x188] sm:$0xff]  ;;  %v1993_v16 = vld [vmem:[#allocation2 + $0x100] sm:$0xff]  ;;  %v94_v27 = vpack.c.bf16 %v58_v1, %v58_v1 }
  0x20   :  { %1165 = vmatpush.bf16.msra.mxu2 %v1978_v28  ;;  %v2018_v15 = vld [vmem:[#allocation2 + $0x1c8] sm:$0xff]  ;;  %v2001_v17 = vld [vmem:[#allocation2 + $0x140] sm:$0xff]  ;;  %v2032_v20 = vld [vmem:[#allocation2 + $0x238] sm:$0xff] }
  0x21   :  { %1178 = vmatpush.bf16.msra.mxu3 %v1986_v29  ;;  %v2009_v18 = vld [vmem:[#allocation2 + $0x180] sm:$0xff]  ;;  %v2040_v21 = vld [vmem:[#allocation2 + $0x278] sm:$0xff]  ;;  %v2031_v28 = vld [vmem:[#allocation2 + $0x230] sm:$0xff] }
  0x22   :  { %1140 = vmatpush.bf16.msra.mxu0 %v1961_v31  ;;  %v2017_v19 = vld [vmem:[#allocation2 + $0x1c0] sm:$0xff]  ;;  %v2048_v22 = vld [vmem:[#allocation2 + $0x2b8] sm:$0xff]  ;;  %v2039_v29 = vld [vmem:[#allocation2 + $0x270] sm:$0xff] }
  0x23   :  { %1153 = vmatpush.bf16.msra.mxu1 %v1969_v32  ;;  %v2056_v23 = vld [vmem:[#allocation2 + $0x2f8] sm:$0xff]  ;;  %v2047_v30 = vld [vmem:[#allocation2 + $0x2b0] sm:$0xff]  ;;  %v2030_v32 = vld [vmem:[#allocation2 + $0x228] sm:$0xff] }
  0x24   :  { %1166 = vmatpush.bf16.msra.mxu2 %v1977_v35  ;;  %v2055_v31 = vld [vmem:[#allocation2 + $0x2f0] sm:$0xff]  ;;  %v2038_v33 = vld [vmem:[#allocation2 + $0x268] sm:$0xff]  ;;  %v2037_v37 = vld [vmem:[#allocation2 + $0x260] sm:$0xff] }
  0x25   :  { %1179 = vmatpush.bf16.msra.mxu3 %v1985_v36  ;;  %1141 = vmatmul.bf16.vlgmr.msra.gmra.mxu0 %v89_v45  ;;  %v2046_v34 = vld [vmem:[#allocation2 + $0x2a8] sm:$0xff]  ;;  %v2029_v36 = vld [vmem:[#allocation2 + $0x220] sm:$0xff]  ;;  %v2035_v45 = vld [vmem:[#allocation2 + $0x250] sm:$0xff] }
  0x26   :  { %1185 = vmatpush.bf16.msrb.mxu0 %v2000_v40  ;;  %1154 = vmatmul.bf16.vlgmr.msra.gmra.mxu1 %v90_v49  ;;  %v2054_v35 = vld [vmem:[#allocation2 + $0x2e8] sm:$0xff]  ;;  %v2045_v38 = vld [vmem:[#allocation2 + $0x2a0] sm:$0xff]  ;;  %v2028_v40 = vld [vmem:[#allocation2 + $0x218] sm:$0xff] }
  0x27   :  { %1198 = vmatpush.bf16.msrb.mxu1 %v2008_v41  ;;  %1167 = vmatmul.bf16.vlgmr.msra.gmra.mxu2 %v91_v44  ;;  %v2053_v39 = vld [vmem:[#allocation2 + $0x2e0] sm:$0xff]  ;;  %v2036_v41 = vld [vmem:[#allocation2 + $0x258] sm:$0xff]  ;;  %v2027_v44 = vld [vmem:[#allocation2 + $0x210] sm:$0xff] }
  0x28   :  { %1211 = vmatpush.bf16.msrb.mxu2 %v2016_v42  ;;  %1180 = vmatmul.bf16.vlgmr.msra.gmra.mxu3 %v92_v48  ;;  %v2044_v42 = vld [vmem:[#allocation2 + $0x298] sm:$0xff]  ;;  %v2043_v46 = vld [vmem:[#allocation2 + $0x290] sm:$0xff]  ;;  %v2026_v48 = vld [vmem:[#allocation2 + $0x208] sm:$0xff] }
  0x29   :  { %1224 = vmatpush.bf16.msrb.mxu3 %v2024_v43  ;;  %v2052_v43 = vld [vmem:[#allocation2 + $0x2d8] sm:$0xff]  ;;  %v2051_v47 = vld [vmem:[#allocation2 + $0x2d0] sm:$0xff]  ;;  %v2034_v49 = vld [vmem:[#allocation2 + $0x248] sm:$0xff] }
  0x2a   :  { %1186 = vmatpush.bf16.msrb.mxu0 %v1999_v50  ;;  %v2042_v50 = vld [vmem:[#allocation2 + $0x288] sm:$0xff]  ;;  %v66_v60 = vld.sshfl [vmem:[#allocation1 + $0x8] sm:$0xff pattern:$0x75316420]  ;;  %v2080_v62 = vld [vmem:[#allocation2 + $0x3b8] sm:$0xff] }
  0x2b   :  { %1199 = vmatpush.bf16.msrb.mxu1 %v2007_v51  ;;  %v2050_v51 = vld [vmem:[#allocation2 + $0x2c8] sm:$0xff]  ;;  %v68_v61 = vld.sshfl [vmem:[#allocation1 + $0x18] sm:$0xff pattern:$0x75316420]  ;;  %v2088_v63 = vld [vmem:[#allocation2 + $0x3f8] sm:$0xff] }
  0x2c   :  { %1212 = vmatpush.bf16.msrb.mxu2 %v2015_v52  ;;  %v2025_v52 = vld [vmem:[#allocation2 + $0x200] sm:$0xff]  ;;  %v67_v59 = vld.sshfl [vmem:[#allocation1 + $0x10] sm:$0xff pattern:$0x75316420] }
  0x2d   :  { %1225 = vmatpush.bf16.msrb.mxu3 %v2023_v53  ;;  %v2033_v53 = vld [vmem:[#allocation2 + $0x240] sm:$0xff]  ;;  %v99_v1 = vpack.c.bf16 %v67_v59, %v67_v59 }
  0x2e   :  { %1187 = vmatpush.bf16.msrb.mxu0 %v1998_v54  ;;  %v2041_v54 = vld [vmem:[#allocation2 + $0x280] sm:$0xff] }
  0x2f   :  { %1200 = vmatpush.bf16.msrb.mxu1 %v2006_v55  ;;  %v2049_v55 = vld [vmem:[#allocation2 + $0x2c0] sm:$0xff] }
  0x30   :  { %1213 = vmatpush.bf16.msrb.mxu2 %v2014_v56  ;;  %v2064_v56 = vld [vmem:[#allocation2 + $0x338] sm:$0xff] }
  0x31   :  { %1226 = vmatpush.bf16.msrb.mxu3 %v2022_v57  ;;  %v2072_v57 = vld [vmem:[#allocation2 + $0x378] sm:$0xff] }
  0x32   :  { %1188 = vmatpush.bf16.msrb.mxu0 %v1997_v58  ;;  %v65_v58 = vld.sshfl [vmem:[#allocation1] sm:$0xff pattern:$0x75316420] }
  0x33   :  { %1201 = vmatpush.bf16.msrb.mxu1 %v2005_v0  ;;  %v97_v0 = vpack.c.bf16 %v65_v58, %v65_v58 }
  0x34   :  { %1214 = vmatpush.bf16.msrb.mxu2 %v2013_v2  ;;  %v98_v2 = vpack.c.bf16 %v66_v60, %v66_v60 }
  0x35   :  { %1227 = vmatpush.bf16.msrb.mxu3 %v2021_v3  ;;  %v100_v3 = vpack.c.bf16 %v68_v61, %v68_v61 }
  0x36   :  { %1189 = vmatpush.bf16.msrb.mxu0 %v1996_v4  ;;  %v2063_v4 = vld [vmem:[#allocation2 + $0x330] sm:$0xff] }
  0x37   :  { %1202 = vmatpush.bf16.msrb.mxu1 %v2004_v5  ;;  %v2071_v5 = vld [vmem:[#allocation2 + $0x370] sm:$0xff] }
  0x38   :  { %1215 = vmatpush.bf16.msrb.mxu2 %v2012_v6  ;;  %v2079_v6 = vld [vmem:[#allocation2 + $0x3b0] sm:$0xff] }
  0x39   :  { %1228 = vmatpush.bf16.msrb.mxu3 %v2020_v7  ;;  %v2087_v7 = vld [vmem:[#allocation2 + $0x3f0] sm:$0xff] }
  0x3a   :  { %1190 = vmatpush.bf16.msrb.mxu0 %v1995_v8  ;;  %v2062_v8 = vld [vmem:[#allocation2 + $0x328] sm:$0xff] }
  0x3b   :  { %1203 = vmatpush.bf16.msrb.mxu1 %v2003_v9  ;;  %v2070_v9 = vld [vmem:[#allocation2 + $0x368] sm:$0xff] }
  0x3c   :  { %1216 = vmatpush.bf16.msrb.mxu2 %v2011_v10  ;;  %v2078_v10 = vld [vmem:[#allocation2 + $0x3a8] sm:$0xff] }
  0x3d   :  { %1229 = vmatpush.bf16.msrb.mxu3 %v2019_v11  ;;  %v2086_v11 = vld [vmem:[#allocation2 + $0x3e8] sm:$0xff] }
  0x3e   :  { %1191 = vmatpush.bf16.msrb.mxu0 %v1994_v12  ;;  %v2061_v12 = vld [vmem:[#allocation2 + $0x320] sm:$0xff] }
  0x3f   :  { %1204 = vmatpush.bf16.msrb.mxu1 %v2002_v13  ;;  %v2069_v13 = vld [vmem:[#allocation2 + $0x360] sm:$0xff] }
  0x40   :  { %1217 = vmatpush.bf16.msrb.mxu2 %v2010_v14  ;;  %v2077_v14 = vld [vmem:[#allocation2 + $0x3a0] sm:$0xff] }
  0x41   :  { %1230 = vmatpush.bf16.msrb.mxu3 %v2018_v15  ;;  %v2085_v15 = vld [vmem:[#allocation2 + $0x3e0] sm:$0xff] }
  0x42   :  { %1192 = vmatpush.bf16.msrb.mxu0 %v1993_v16  ;;  %v2060_v16 = vld [vmem:[#allocation2 + $0x318] sm:$0xff] }
  0x43   :  { %1205 = vmatpush.bf16.msrb.mxu1 %v2001_v17  ;;  %v2068_v17 = vld [vmem:[#allocation2 + $0x358] sm:$0xff] }
  0x44   :  { %1218 = vmatpush.bf16.msrb.mxu2 %v2009_v18  ;;  %v2076_v18 = vld [vmem:[#allocation2 + $0x398] sm:$0xff] }
  0x45   :  { %1231 = vmatpush.bf16.msrb.mxu3 %v2017_v19  ;;  %1193 = vmatmul.bf16.vlgmr.msrb.gmra.mxu0 %v93_v25  ;;  %v2084_v19 = vld [vmem:[#allocation2 + $0x3d8] sm:$0xff]  ;;  %v2066_v25 = vld [vmem:[#allocation2 + $0x348] sm:$0xff] }
  0x46   :  { %1237 = vmatpush.bf16.msra.mxu0 %v2032_v20  ;;  %1206 = vmatmul.bf16.vlgmr.msrb.gmra.mxu1 %v94_v27  ;;  %v2059_v20 = vld [vmem:[#allocation2 + $0x310] sm:$0xff]  ;;  %v2082_v27 = vld [vmem:[#allocation2 + $0x3c8] sm:$0xff] }
  0x47   :  { %1250 = vmatpush.bf16.msra.mxu1 %v2040_v21  ;;  %1219 = vmatmul.bf16.vlgmr.msrb.gmra.mxu2 %v95_v24  ;;  %v2067_v21 = vld [vmem:[#allocation2 + $0x350] sm:$0xff]  ;;  %v2058_v24 = vld [vmem:[#allocation2 + $0x308] sm:$0xff] }
  0x48   :  { %1263 = vmatpush.bf16.msra.mxu2 %v2048_v22  ;;  %1232 = vmatmul.bf16.vlgmr.msrb.gmra.mxu3 %v96_v26  ;;  %v2075_v22 = vld [vmem:[#allocation2 + $0x390] sm:$0xff]  ;;  %v2074_v26 = vld [vmem:[#allocation2 + $0x388] sm:$0xff] }
  0x49   :  { %1276 = vmatpush.bf16.msra.mxu3 %v2056_v23  ;;  %v2083_v23 = vld [vmem:[#allocation2 + $0x3d0] sm:$0xff] }
  0x4a   :  { %1238 = vmatpush.bf16.msra.mxu0 %v2031_v28  ;;  %v2057_v28 = vld [vmem:[#allocation2 + $0x300] sm:$0xff] }
  0x4b   :  { %1251 = vmatpush.bf16.msra.mxu1 %v2039_v29  ;;  %v2065_v29 = vld [vmem:[#allocation2 + $0x340] sm:$0xff] }
  0x4c   :  { %1264 = vmatpush.bf16.msra.mxu2 %v2047_v30  ;;  %v2073_v30 = vld [vmem:[#allocation2 + $0x380] sm:$0xff] }
  0x4d   :  { %1277 = vmatpush.bf16.msra.mxu3 %v2055_v31  ;;  %v2081_v31 = vld [vmem:[#allocation2 + $0x3c0] sm:$0xff] }
  0x4e   :  { %1239 = vmatpush.bf16.msra.mxu0 %v2030_v32  ;;  %v69_v32 = vld.sshfl [vmem:[#allocation1 + $0x20] sm:$0xff pattern:$0x75316420] }
  0x4f   :  { %1252 = vmatpush.bf16.msra.mxu1 %v2038_v33  ;;  %v70_v33 = vld.sshfl [vmem:[#allocation1 + $0x28] sm:$0xff pattern:$0x75316420] }
  0x50   :  { %1265 = vmatpush.bf16.msra.mxu2 %v2046_v34  ;;  %v71_v34 = vld.sshfl [vmem:[#allocation1 + $0x30] sm:$0xff pattern:$0x75316420] }
  0x51   :  { %1278 = vmatpush.bf16.msra.mxu3 %v2054_v35  ;;  %v72_v35 = vld.sshfl [vmem:[#allocation1 + $0x38] sm:$0xff pattern:$0x75316420] }
  0x52   :  { %1240 = vmatpush.bf16.msra.mxu0 %v2029_v36  ;;  %v101_v36 = vpack.c.bf16 %v69_v32, %v69_v32 }
  0x53   :  { %1253 = vmatpush.bf16.msra.mxu1 %v2037_v37  ;;  %v102_v37 = vpack.c.bf16 %v70_v33, %v70_v33 }
  0x54   :  { %1266 = vmatpush.bf16.msra.mxu2 %v2045_v38  ;;  %v103_v38 = vpack.c.bf16 %v71_v34, %v71_v34 }
  0x55   :  { %1279 = vmatpush.bf16.msra.mxu3 %v2053_v39  ;;  %v104_v39 = vpack.c.bf16 %v72_v35, %v72_v35 }
  0x56   :  { %1241 = vmatpush.bf16.msra.mxu0 %v2028_v40  ;;  %v2093_v40 = vld [vmem:[%s2195_s2] ss:$0 sm:$0xff] }
  0x57   :  { %1254 = vmatpush.bf16.msra.mxu1 %v2036_v41 }
  0x58   :  { %1267 = vmatpush.bf16.msra.mxu2 %v2044_v42 }
  0x59   :  { %1280 = vmatpush.bf16.msra.mxu3 %v2052_v43 }
  0x5a   :  { %1242 = vmatpush.bf16.msra.mxu0 %v2027_v44 }
  0x5b   :  { %1255 = vmatpush.bf16.msra.mxu1 %v2035_v45 }
  0x5c   :  { %1268 = vmatpush.bf16.msra.mxu2 %v2043_v46 }
  0x5d   :  { %1281 = vmatpush.bf16.msra.mxu3 %v2051_v47 }
  0x5e   :  { %1243 = vmatpush.bf16.msra.mxu0 %v2026_v48 }
  0x5f   :  { %1256 = vmatpush.bf16.msra.mxu1 %v2034_v49 }
  0x60   :  { %1269 = vmatpush.bf16.msra.mxu2 %v2042_v50 }
  0x61   :  { %1282 = vmatpush.bf16.msra.mxu3 %v2050_v51 }
  0x62   :  { %1244 = vmatpush.bf16.msra.mxu0 %v2025_v52 }
  0x63   :  { %1257 = vmatpush.bf16.msra.mxu1 %v2033_v53 }
  0x64   :  { %1270 = vmatpush.bf16.msra.mxu2 %v2041_v54 }
  0x65   :  { %1283 = vmatpush.bf16.msra.mxu3 %v2049_v55  ;;  %1245 = vmatmul.bf16.vlgmr.msra.gmra.mxu0 %v97_v0 }
  0x66   :  { %1289 = vmatpush.bf16.msrb.mxu0 %v2064_v56  ;;  %1258 = vmatmul.bf16.vlgmr.msra.gmra.mxu1 %v98_v2 }
  0x67   :  { %1302 = vmatpush.bf16.msrb.mxu1 %v2072_v57  ;;  %1271 = vmatmul.bf16.vlgmr.msra.gmra.mxu2 %v99_v1 }
  0x68   :  { %1315 = vmatpush.bf16.msrb.mxu2 %v2080_v62  ;;  %1284 = vmatmul.bf16.vlgmr.msra.gmra.mxu3 %v100_v3 }
  0x69   :  { %1328 = vmatpush.bf16.msrb.mxu3 %v2088_v63 }
  0x6a   :  { %1290 = vmatpush.bf16.msrb.mxu0 %v2063_v4 }
  0x6b   :  { %1303 = vmatpush.bf16.msrb.mxu1 %v2071_v5 }
  0x6c   :  { %1316 = vmatpush.bf16.msrb.mxu2 %v2079_v6 }
  0x6d   :  { %1329 = vmatpush.bf16.msrb.mxu3 %v2087_v7 }
  0x6e   :  { %1291 = vmatpush.bf16.msrb.mxu0 %v2062_v8 }
  0x6f   :  { %1304 = vmatpush.bf16.msrb.mxu1 %v2070_v9 }
  0x70   :  { %1317 = vmatpush.bf16.msrb.mxu2 %v2078_v10  ;;  %v1341_v10 = vlaneseq }
  0x71   :  { %1330 = vmatpush.bf16.msrb.mxu3 %v2086_v11 }
  0x72   :  { %1292 = vmatpush.bf16.msrb.mxu0 %v2061_v12  ;;  %v1342_v12 = vshrl.u32 %v1341_v10, 7 }
  0x73   :  { %1305 = vmatpush.bf16.msrb.mxu1 %v2069_v13 }
  0x74   :  { %1318 = vmatpush.bf16.msrb.mxu2 %v2077_v14  ;;  %v1345_v14 = vmul.u32 2, %v1342_v12 }
  0x75   :  { %1331 = vmatpush.bf16.msrb.mxu3 %v2085_v15 }
  0x76   :  { %1293 = vmatpush.bf16.msrb.mxu0 %v2060_v16 }
  0x77   :  { %1306 = vmatpush.bf16.msrb.mxu1 %v2068_v17 }
  0x78   :  { %1319 = vmatpush.bf16.msrb.mxu2 %v2076_v18 }
  0x79   :  { %1332 = vmatpush.bf16.msrb.mxu3 %v2084_v19  ;;  %v1344_v19 = vand.u32 127, %v1341_v10 }
  0x7a   :  { %1294 = vmatpush.bf16.msrb.mxu0 %v2059_v20  ;;  %v1349_v20 = vadd.s32 1, %v1345_v14 }
  0x7b   :  { %1307 = vmatpush.bf16.msrb.mxu1 %v2067_v21  ;;  %vm1346_vm0 = vcmp.eq.s32.totalorder %v1344_v19, %v1345_v14 }
  0x7c   :  { %1320 = vmatpush.bf16.msrb.mxu2 %v2075_v22  ;;  %vm1350_vm1 = vcmp.eq.s32.totalorder %v1344_v19, %v1349_v20 }
  0x7d   :  { %1333 = vmatpush.bf16.msrb.mxu3 %v2083_v23 }
  0x7e   :  { %1295 = vmatpush.bf16.msrb.mxu0 %v2058_v24 }
  0x7f   :  { %1308 = vmatpush.bf16.msrb.mxu1 %v2066_v25 }
  0x80   :  { %1321 = vmatpush.bf16.msrb.mxu2 %v2074_v26 }
  0x81   :  { %1334 = vmatpush.bf16.msrb.mxu3 %v2082_v27 }
  0x82   :  { %1296 = vmatpush.bf16.msrb.mxu0 %v2057_v28  ;;  %v2127_v28 = vmov 0.0  }
  0x83   :  { %1309 = vmatpush.bf16.msrb.mxu1 %v2065_v29  ;;  %v1955_v29 = vsel %vm1346_vm0, 1.0, %v2127_v28 }
  0x84   :  { %1322 = vmatpush.bf16.msrb.mxu2 %v2073_v30  ;;  %v1956_v30 = vsel %vm1350_vm1, 1.0, %v2127_v28 }
  0x85   :  { %1335 = vmatpush.bf16.msrb.mxu3 %v2081_v31  ;;  %1297 = vmatmul.bf16.vlgmr.msrb.gmra.mxu0 %v101_v36 }
  0x86   :  { %1310 = vmatmul.bf16.vlgmr.msrb.gmra.mxu1 %v102_v37 }
  0x87   :  { %1323 = vmatmul.bf16.vlgmr.msrb.gmra.mxu2 %v103_v38 }
  0x88   :  { %1336 = vmatmul.bf16.vlgmr.msrb.gmra.mxu3 %v104_v39 }
  0xa2   :  { %v1142_v41 = vpop.f32.mrf.mxu0 }
  0xa3   :  { %v1143_v42 = vadd.f32 %v2093_v40, %v1142_v41  ;;  %v1155_v43 = vpop.f32.mrf.mxu1 }
  0xa5   :  { %v1156_v44 = vadd.f32 %v1155_v43, %v1143_v42 }
  0xaa   :  { %v1168_v45 = vpop.f32.mrf.mxu2  ;;  %v1144_v48 = vpop.f32.mrf.mxu0 }
  0xab   :  { %v1169_v46 = vadd.f32 %v1168_v45, %v1156_v44  ;;  %v1181_v47 = vpop.f32.mrf.mxu3  ;;  %v1157_v50 = vpop.f32.mrf.mxu1 }
  0xad   :  { %v1182_v49 = vadd.f32 %v1181_v47, %v1169_v46 }
  0xb2   :  { %v1170_v51 = vpop.f32.mrf.mxu2 }
  0xb3   :  { %v1183_v52 = vpop.f32.mrf.mxu3 }
  0xc2   :  { %v1194_v53 = vpop.f32.mrf.mxu0 }
  0xc3   :  { %v1207_v54 = vpop.f32.mrf.mxu1  ;;  %v1195_v63 = vadd.f32 %v1194_v53, %v1182_v49 }
  0xc5   :  { %v1208_v3 = vadd.f32 %v1207_v54, %v1195_v63 }
  0xca   :  { %v1220_v55 = vpop.f32.mrf.mxu2  ;;  %v1196_v57 = vpop.f32.mrf.mxu0 }
  0xcb   :  { %v1233_v56 = vpop.f32.mrf.mxu3  ;;  %v1209_v58 = vpop.f32.mrf.mxu1  ;;  %v1221_v5 = vadd.f32 %v1220_v55, %v1208_v3 }
  0xcd   :  { %v1234_v8 = vadd.f32 %v1233_v56, %v1221_v5 }
  0xd2   :  { %v1222_v59 = vpop.f32.mrf.mxu2 }
  0xd3   :  { %v1235_v60 = vpop.f32.mrf.mxu3 }
  0xe2   :  { %v1246_v61 = vpop.f32.mrf.mxu0 }
  0xe3   :  { %v1259_v62 = vpop.f32.mrf.mxu1  ;;  %v1247_v9 = vadd.f32 %v1246_v61, %v1234_v8 }
  0xe5   :  { %v1260_v11 = vadd.f32 %v1259_v62, %v1247_v9 }
  0xea   :  { %v1272_v0 = vpop.f32.mrf.mxu2  ;;  %v1248_v2 = vpop.f32.mrf.mxu0 }
  0xeb   :  { %v1285_v1 = vpop.f32.mrf.mxu3  ;;  %v1261_v4 = vpop.f32.mrf.mxu1  ;;  %v1273_v13 = vadd.f32 %v1272_v0, %v1260_v11 }
  0xed   :  { %v1286_v15 = vadd.f32 %v1285_v1, %v1273_v13 }
  0xf2   :  { %v1274_v6 = vpop.f32.mrf.mxu2 }
  0xf3   :  { %v1287_v7 = vpop.f32.mrf.mxu3 }
 0x102   :  { %v1298_v16 = vpop.f32.mrf.mxu0 }
 0x103   :  { %v1311_v17 = vpop.f32.mrf.mxu1  ;;  %v1299_v18 = vadd.f32 %v1298_v16, %v1286_v15 }
 0x105   :  { %v1312_v21 = vadd.f32 %v1311_v17, %v1299_v18 }
 0x10a   :  { %v1324_v22 = vpop.f32.mrf.mxu2  ;;  %v1300_v25 = vpop.f32.mrf.mxu0 }
 0x10b   :  { %v1337_v23 = vpop.f32.mrf.mxu3  ;;  %v1325_v24 = vadd.f32 %v1324_v22, %v1312_v21  ;;  %v1313_v26 = vpop.f32.mrf.mxu1 }
 0x10d   :  { %v1338_v27 = vadd.f32 %v1337_v23, %v1325_v24 }
 0x10f   :  { %1957 = vmatpush.msk.msra.mxu0 %vm1357_vm2, %v1338_v27  ;;  %1959 = vmatpush.msk.msra.mxu1 %vm1357_vm2, %v1338_v27 }
 0x110   :  { %1958 = vmatmul.msk.f32.vlgmr.msra.gmra.mxu0 %vm1353_vm3, %v1955_v29  ;;  %1960 = vmatmul.msk.f32.vlgmr.msra.gmra.mxu1 %vm1353_vm3, %v1956_v30 }
 0x112   :  { %v1326_v31 = vpop.f32.mrf.mxu2 }
 0x113   :  { %v1339_v32 = vpop.f32.mrf.mxu3 }
 0x18d   :  { %v1378_v33 = vpop.f32.mrf.mxu0  ;;  %v1401_v34 = vpop.f32.mrf.mxu1 }
 0x18e   :  { %v1407_v35 = vmul.f32 %v1378_v33, %v1378_v33  ;;  %v1404_v36 = vmul.f32 %v1401_v34, %v1378_v33  ;;  %v1410_v37 = vmul.f32 %v1401_v34, %v1401_v34 }
 0x190   :  { %1408 = vadd.xlane.f32.xlu0 %v1407_v35  ;;  %1405 = vadd.xlane.f32.xlu1 %v1404_v36 }
 0x198   :  { %1411 = vadd.xlane.f32.xlu0 %v1410_v37 }
 0x203   :  { %v1409_v38 = vpop.xlane.xlu0 %1408  ;;  %v1406_v55 = vpop.xlane.xlu1 %1405 }
 0x204   :  { %v1413_v39 = vmax.f32 %v1409_v38, 1e-16 }
 0x206   :  { %2094 = vrsqrt.f32 %v1413_v39  ;;  %vm1420_vm5 = vweird.f32 %v1413_v39 }
 0x20b   :  { %v1412_v40 = vpop.xlane.xlu0 %1411 }
 0x20c   :  { %v2095_v41 = vpop.eup %2094  ;;  %v1424_v42 = vmax.f32 %v1412_v40, 1e-16 }
 0x20d   :  { %v1415_v43 = vmul.f32 %v2095_v41, %v1413_v39  ;;  %vm1421_vm4 = vweird.f32 %v2095_v41 }
 0x20e   :  { %2096 = vrsqrt.f32 %v1424_v42  ;;  %vm1422_vm6 = vmor %vm1420_vm5, %vm1421_vm4  ;;  %vm1431_vm8 = vweird.f32 %v1424_v42 }
 0x20f   :  { %v1416_v44 = vmul.f32 %v2095_v41, %v1415_v43 }
 0x211   :  { %v1417_v45 = vmul.f32 0.5, %v1416_v44 }
 0x213   :  { %v1418_v46 = vsub.f32 1.5, %v1417_v45 }
 0x214   :  { %v2097_v47 = vpop.eup %2096 }
 0x215   :  { %v1426_v48 = vmul.f32 %v2097_v47, %v1424_v42  ;;  %v1419_v50 = vmul.f32 %v2095_v41, %v1418_v46  ;;  %vm1432_vm7 = vweird.f32 %v2097_v47 }
 0x216   :  { %vm1433_vm9 = vmor %vm1431_vm8, %vm1432_vm7 }
 0x217   :  { %v1427_v49 = vmul.f32 %v2097_v47, %v1426_v48  ;;  %v1423_v53 = vsel %vm1422_vm6, %v2095_v41, %v1419_v50 }
 0x218   :  { %v1435_v56 = vmul.f32 %v1423_v53, %v1406_v55 }
 0x219   :  { %v1428_v51 = vmul.f32 0.5, %v1427_v49 }
 0x21b   :  { %v1429_v52 = vsub.f32 1.5, %v1428_v51 }
 0x21d   :  { %v1430_v54 = vmul.f32 %v2097_v47, %v1429_v52 }
 0x21f   :  { %v1434_v57 = vsel %vm1433_vm9, %v2097_v47, %v1430_v54 }
 0x220   :  { %v1436_v58 = vmul.f32 %v1435_v56, %v1434_v57 }
 0x222   :  { %1437 = vst [vmem:[%s2196_s3] sm:$0xff] %v1436_v58 }
 0x223   :  { %1442 = vsyncpa [#allocation3], 1 }

</bundles_post_ra>
